<compile_context>
chip_gen: v7x
topology: tpu7x:2x2x1
jax: 0.10.0
libtpu: 0.0.40
codegen_flags: <defaults>
</compile_context>

<pallas_src>
import jax
import jax.numpy as jnp
from jax.experimental import pallas as pl
from jax.experimental.pallas import tpu as pltpu

_LANE = 128


def _augmenter_kernel(x_ref, gain_ref, noise_ref, out_ref):
    # One fused pass per time tile:
    #   out[0] = x                      (concat_original branch)
    #   out[1] = gain * x + noise       (augment branch)
    xv = x_ref[...]
    out_ref[0] = xv
    out_ref[1] = gain_ref[...] * xv + noise_ref[...]


def _chip_config():
    """Chip-derived VMEM budgets + multi-TensorCore flag (heuristic, safe fallback)."""
    kind = ""
    try:
        kind = jax.devices()[0].device_kind.lower()
    except Exception:
        pass
    if "v7" in kind:
        # 64 MiB VMEM per TensorCore, 2 TensorCores per chip.
        return {"block_budget": 12 << 20, "vmem_limit": 32 << 20, "multi_core": True}
    if "v4" in kind or "v5p" in kind:
        # 128 MiB-class VMEM, megacore (2 TCs behind one device).
        return {"block_budget": 16 << 20, "vmem_limit": 64 << 20, "multi_core": True}
    if "v5" in kind or "v6" in kind:
        # v5e / v6e: 128 MiB physical VMEM, single TensorCore.
        return {"block_budget": 16 << 20, "vmem_limit": 64 << 20, "multi_core": False}
    # Unknown chip: conservative settings that fit every generation.
    return {"block_budget": 8 << 20, "vmem_limit": 32 << 20, "multi_core": False}


def _pick_time_tile(T, B, dtype_bytes, block_budget, multi_core):
    """Time tile from a VMEM budget; no divisibility requirement on T."""
    # Double-buffered per-step footprint ~= 2*(x[B,t] + noise[B,t] + out[2B,t])
    #                                     = 8*B*t*dtype_bytes
    cap = max(_LANE, (block_budget // (8 * B * dtype_bytes)) // _LANE * _LANE)
    if multi_core and T >= 2 * _LANE:
        # Ensure at least 2 grid steps so both TensorCores get work
        # ("parallel" time axis); skipped on single-TC chips.
        half = -(-T // 2)
        half = -(-half // _LANE) * _LANE
        cap = min(cap, half)
    if T <= cap:
        return T          # single full-extent block (always layout-legal)
    return cap            # lane-multiple tile; final grid block is partial/masked


def rl_augmenter_forward(x, lengths, gain, noise, *, time_tile=None):
    """Pallas forward of rl_Augmenter (concat_original=True, 1 augmentation)."""
    B, T = x.shape
    dtype_bytes = jnp.dtype(x.dtype).itemsize
    cfg = _chip_config()

    if time_tile is None:
        time_tile = _pick_time_tile(T, B, dtype_bytes, cfg["block_budget"],
                                     cfg["multi_core"])
    assert time_tile == T or time_tile % _LANE == 0

    grid_t = pl.cdiv(T, time_tile)

    # Make sure the double-buffered footprint fits the scoped VMEM limit even
    # for large B (the tile never shrinks below one lane-width).
    # TODO(synk): for extremely large B, also tile the batch dimension.
    needed = 8 * B * time_tile * dtype_bytes + (2 << 20)
    vmem_limit = max(cfg["vmem_limit"], needed)

    out = pl.pallas_call(
        _augmenter_kernel,
        out_shape=jax.ShapeDtypeStruct((2, B, T), x.dtype),
        grid_spec=pltpu.PrefetchScalarGridSpec(
            num_scalar_prefetch=0,
            grid=(grid_t,),
            in_specs=[
                pl.BlockSpec((B, time_tile), lambda t: (0, t)),   # x
                pl.BlockSpec((B, 1),         lambda t: (0, 0)),   # gain (full array)
                pl.BlockSpec((B, time_tile), lambda t: (0, t)),   # noise
            ],
            out_specs=pl.BlockSpec((2, B, time_tile), lambda t: (0, 0, t)),
        ),
        compiler_params=pltpu.CompilerParams(
            # TODO(synk): on v7x, pltpu.CORE_PARALLEL on the time axis may
            # guarantee the 2-TC split; "parallel" is the portable choice.
            dimension_semantics=("parallel",),
            vmem_limit_bytes=vmem_limit,
        ),
    )(x, gain, noise)

    # (2, B, T) -> (2B, T) is a free contiguous view; rows [0:B) are the
    # original signal, rows [B:2B) the augmented one (== torch.cat(dim=0)).
    out = out.reshape(2 * B, T)

    # concatenate_outputs(): both chunks have time dim T, so max_len == T and
    # the length scale factor T/max_len == 1.0; lengths are simply replicated.
    out_lengths = jnp.concatenate([lengths, lengths], axis=0)
    return out, out_lengths


if __name__ == "__main__":
    key = jax.random.PRNGKey(0)
    kx, kg, kn, kx2, kn2, kx3, kn3 = jax.random.split(key, 7)

    B = 8
    lengths = jnp.ones((B,), dtype=jnp.float32)          # relative lengths in [0, 1]
    gain = 0.9 + 0.2 * jax.random.uniform(kg, (B, 1), dtype=jnp.float32)
    ref_len = jnp.concatenate([lengths, lengths], axis=0)

    # ---- case 1: lane-aligned time dim -------------------------------------
    T = 256
    x = jax.random.normal(kx, (B, T), dtype=jnp.float32)
    noise = 0.01 * jax.random.normal(kn, (B, T), dtype=jnp.float32)
    out, out_lengths = rl_augmenter_forward(x, lengths, gain, noise)
    out = jax.block_until_ready(out)
    out_lengths = jax.block_until_ready(out_lengths)
    ref = jnp.concatenate([x, gain * x + noise], axis=0)
    assert out.shape == (2 * B, T) and out_lengths.shape == (2 * B,)
    assert jnp.allclose(out, ref, atol=1e-6)
    assert jnp.allclose(out_lengths, ref_len)

    # ---- case 2: ragged (non-multiple-of-128) time dim, no pad/slice -------
    T2 = 200
    x2 = jax.random.normal(kx2, (B, T2), dtype=jnp.float32)
    noise2 = 0.01 * jax.random.normal(kn2, (B, T2), dtype=jnp.float32)
    out2, out_len2 = rl_augmenter_forward(x2, lengths, gain, noise2)
    out2 = jax.block_until_ready(out2)
    ref2 = jnp.concatenate([x2, gain * x2 + noise2], axis=0)
    assert out2.shape == (2 * B, T2)
    assert jnp.allclose(out2, ref2, atol=1e-6)
    assert jnp.allclose(out_len2, ref_len)

    # ---- case 3: multi-step grid with a partial/masked final block ---------
    T3 = 400
    x3 = jax.random.normal(kx3, (B, T3), dtype=jnp.float32)
    noise3 = 0.01 * jax.random.normal(kn3, (B, T3), dtype=jnp.float32)
    out3, out_len3 = rl_augmenter_forward(x3, lengths, gain, noise3, time_tile=256)
    out3 = jax.block_until_ready(out3)
    ref3 = jnp.concatenate([x3, gain * x3 + noise3], axis=0)
    assert out3.shape == (2 * B, T3)
    assert jnp.allclose(out3, ref3, atol=1e-6)
    assert jnp.allclose(out_len3, ref_len)

    print("KERNEL_OK")
</pallas_src>

<mosaic_0001>
module attributes {stable_mosaic.version = 11 : i64} {
  func.func @_augmenter_kernel(%arg0: i32, %arg1: memref<8x256xf32, #tpu.memory_space<vmem>>, %arg2: memref<8x1xf32, #tpu.memory_space<vmem>>, %arg3: memref<8x256xf32, #tpu.memory_space<vmem>>, %arg4: memref<2x8x256xf32, #tpu.memory_space<vmem>>) attributes {dimension_semantics = [#tpu.dimension_semantics<parallel>], iteration_bounds = array<i64: 1>, scalar_prefetch = 0 : i64, scratch_operands = 0 : i64, tpu.core_type = #tpu.core_type<tc>, window_params = [{transform_indices = @transform_0, window_bounds = array<i64: 8, 256>}, {pipeline_mode = #tpu.pipeline_mode<synchronous>, transform_indices = @transform_1, window_bounds = array<i64: 8, 1>}, {transform_indices = @transform_2, window_bounds = array<i64: 8, 256>}, {transform_indices = @transform_3, window_bounds = array<i64: 2, 8, 256>}]} {
    %c0 = arith.constant 0 : index
    %c0_0 = arith.constant 0 : index
    %0 = vector.load %arg1[%c0, %c0_0] : memref<8x256xf32, #tpu.memory_space<vmem>>, vector<8x256xf32>
    %c0_1 = arith.constant 0 : index
    %c0_2 = arith.constant 0 : index
    %c0_3 = arith.constant 0 : index
    %1 = vector.load %arg4[%c0_1, %c0_2, %c0_3] : memref<2x8x256xf32, #tpu.memory_space<vmem>>, vector<1x8x256xf32>
    %2 = vector.shape_cast %1 : vector<1x8x256xf32> to vector<8x256xf32>
    %3 = vector.shape_cast %0 : vector<8x256xf32> to vector<1x8x256xf32>
    tpu.vector_store %arg4[%c0_1, %c0_2, %c0_3], %3 {strides = array<i32>} : memref<2x8x256xf32, #tpu.memory_space<vmem>>, vector<1x8x256xf32>,
    %c0_4 = arith.constant 0 : index
    %c0_5 = arith.constant 0 : index
    %4 = vector.load %arg2[%c0_4, %c0_5] : memref<8x1xf32, #tpu.memory_space<vmem>>, vector<8x1xf32>
    %5 = vector.broadcast %4 : vector<8x1xf32> to vector<8x256xf32>
    %6 = arith.mulf %5, %0 : vector<8x256xf32>
    %c0_6 = arith.constant 0 : index
    %c0_7 = arith.constant 0 : index
    %7 = vector.load %arg3[%c0_6, %c0_7] : memref<8x256xf32, #tpu.memory_space<vmem>>, vector<8x256xf32>
    %8 = arith.addf %6, %7 : vector<8x256xf32>
    %c1 = arith.constant 1 : index
    %c0_8 = arith.constant 0 : index
    %c0_9 = arith.constant 0 : index
    %9 = vector.load %arg4[%c1, %c0_8, %c0_9] : memref<2x8x256xf32, #tpu.memory_space<vmem>>, vector<1x8x256xf32>
    %10 = vector.shape_cast %9 : vector<1x8x256xf32> to vector<8x256xf32>
    %11 = vector.shape_cast %8 : vector<8x256xf32> to vector<1x8x256xf32>
    tpu.vector_store %arg4[%c1, %c0_8, %c0_9], %11 {strides = array<i32>} : memref<2x8x256xf32, #tpu.memory_space<vmem>>, vector<1x8x256xf32>,
    return
  }
  func.func @transform_0(%arg0: i32) -> (i32, i32) {
    %c0_i32 = arith.constant 0 : i32
    %c0_i32_0 = arith.constant 0 : i32
    return %c0_i32, %arg0 : i32, i32
  }
  func.func @transform_1(%arg0: i32) -> (i32, i32) {
    %c0_i32 = arith.constant 0 : i32
    %c0_i32_0 = arith.constant 0 : i32
    %c0_i32_1 = arith.constant 0 : i32
    return %c0_i32, %c0_i32_0 : i32, i32
  }
  func.func @transform_2(%arg0: i32) -> (i32, i32) {
    %c0_i32 = arith.constant 0 : i32
    %c0_i32_0 = arith.constant 0 : i32
    return %c0_i32, %arg0 : i32, i32
  }
  func.func @transform_3(%arg0: i32) -> (i32, i32, i32) {
    %c0_i32 = arith.constant 0 : i32
    %c0_i32_0 = arith.constant 0 : i32
    %c0_i32_1 = arith.constant 0 : i32
    return %c0_i32, %c0_i32_0, %arg0 : i32, i32, i32
  }
}

</mosaic_0001>

<bundles_post_ra>
// kernel: tpu_custom_call.1
= control target key start
LH: loop header
LB: loop body
LE: loop exit
PB: predicated region body
PF: predicated region fallthrough
CT: control target
= control target key end

     0   :  { %8 = vsyncpa [#allocation3], 0  ;;  %s175_s0 = inlined_call_operand.hbm [shape: f32[8,256], index: 0, kind: input, shape index: {}]   ;;  %s176_s1 = inlined_call_operand.vmem [shape: f32[8,1], index: 1, kind: input, shape index: {}]   ;;  %s177_s2 = inlined_call_operand.vmem [shape: f32[8,256], index: 2, kind: input, shape index: {}]   ;;  %s178_s3 = inlined_call_operand.hbm [shape: f32[2,8,256], index: 3, kind: output, shape index: {}]  }
   0x1   :  { %9 = vsyncpa [#allocation4], 0  ;;  %s117_s12 = smov [#allocation2]   ;;  %s69_s16 = scalar_lea.hbm %s175_s0, 256 }
   0x2   :  { %s16_s13 = sshll.u32 %s117_s12, 4  ;;  %p70_p0 = scmp.ne.s32.totalorder %s175_s0, %s69_s16  ;;  %s17_s13 = int_to_ptr.vmem [resolvable:$true] %s16_s13 }
   0x3   :  { %p73_p1 = scmp.lt.u32.totalorder %s69_s16, %s175_s0 }
   0x5   :  { %p75_p2 = pnand %p73_p1, %p70_p0 }
   0x7   :  { %78 = shalt.err (!%p75_p2)
}
   0x8   :  { %s79_s21 = scalar_lea.vmem %s17_s13, 256  ;;  %p84_p4 = scmp.lt.s32.totalorder %s17_s13, %s17_s13 }
   0x9   :  { %p80_p3 = scmp.ne.s32.totalorder %s17_s13, %s79_s21  ;;  %p85_p5 = scmp.lt.s32.totalorder %s79_s21, %s79_s21 }
   0xb   :  { %p86_p6 = por %p85_p5, %p84_p4 }
   0xd   :  { %p87_p7 = pnand %p86_p6, %p80_p3 }
   0xf   :  { %90 = shalt.err (!%p87_p7)
}
  0x10   :  { %19 = dma.hbm_to_vmem [thread:$0]  %s175_s0, 256, %s17_s13, [#allocation3]  }
  0x11   :  { %113 = dma.done.wait [#allocation3], 256  }
  0x12   :  { %114 = vsyncadd [#allocation3], 4294967040  ;;  %v118_v0 = vmov 0   ;;  %v31_v1 = vld [vmem:[%s176_s1] sm:$0xff]  ;;  %v28_v3 = vld [vmem:[#allocation2 + $0x8] sm:$0xff]  ;;  %s119_s26 = smov [#allocation5]  }
  0x13   :  { %68 = vset.pattern.permute.xlu0 %v118_v0  ;;  %v27_v2 = vld [vmem:[#allocation2] sm:$0xff]  ;;  %30 = vst [vmem:[#allocation5 + $0x8] sm:$0xff] %v28_v3  ;;  %s51_s27 = sshll.u32 %s119_s26, 4  ;;  %v40_v5 = vld [vmem:[%s177_s2 + $0x8] sm:$0xff]  ;;  %s52_s27 = int_to_ptr.vmem [resolvable:$true] %s51_s27 }
  0x14   :  { %34 = vperm.xlu0 %68, %v31_v1   ;;  %29 = vst [vmem:[#allocation5] sm:$0xff] %v27_v2  ;;  %v39_v4 = vld [vmem:[%s177_s2] sm:$0xff]  ;;  %s91_s1 = scalar_lea.vmem %s52_s27, 512  ;;  %p96_p9 = scmp.lt.s32.totalorder %s52_s27, %s52_s27 }
  0x15   :  { %p92_p8 = scmp.ne.s32.totalorder %s52_s27, %s91_s1  ;;  %p97_p10 = scmp.lt.s32.totalorder %s91_s1, %s91_s1 }
  0x17   :  { %p98_p11 = por %p97_p10, %p96_p9 }
  0x19   :  { %p99_p12 = pnand %p98_p11, %p92_p8 }
  0x93   :  { %v35_v6 = vpop.permute.xlu0 %34 }
  0x94   :  { %v37_v7 = vmul.f32 %v35_v6, %v27_v2  ;;  %v38_v8 = vmul.f32 %v35_v6, %v28_v3 }
  0x96   :  { %v41_v9 = vadd.f32 %v39_v4, %v37_v7  ;;  %v42_v10 = vadd.f32 %v40_v5, %v38_v8 }
  0x98   :  { %44 = vst [vmem:[#allocation5 + $0x10] sm:$0xff] %v41_v9  ;;  %45 = vst [vmem:[#allocation5 + $0x18] sm:$0xff] %v42_v10 }
  0x99   :  { %102 = shalt.err (!%p99_p12)
}
  0x9a   :  { %s103_s6 = scalar_lea.hbm %s178_s3, 512 }
  0x9b   :  { %p104_p13 = scmp.ne.s32.totalorder %s178_s3, %s103_s6  ;;  %p107_p0 = scmp.lt.u32.totalorder %s103_s6, %s178_s3 }
  0x9d   :  { %p109_p1 = pnand %p107_p0, %p104_p13 }
  0x9f   :  { %112 = shalt.err (!%p109_p1)
}
  0xa0   :  { %s120_s10 = smov 256   ;;  %s121_s11 = smov 16  }
  0xa1   :  { %57 = dma.vmem_to_hbm [thread:$0]  %s52_s27, 512, %s178_s3, [#allocation4], %s120_s10, %s120_s10, %s121_s11  }
  0xa2   :  { %115 = dma.done.wait [#allocation4], 512  }
  0xa3   :  { %116 = vsyncadd [#allocation4], 4294966784 }
  0xa4   :  { %61 = vsyncpa [#allocation3], 1 }
  0xa5   :  { %62 = vsyncpa [#allocation4], 1 }

</bundles_post_ra>
